<compile_context>
chip_gen: v5e
topology: v5e:2x2
jax: 0.10.0
libtpu: 0.0.40
codegen_flags: <defaults>
</compile_context>

<pallas_src>
import functools

import jax
import jax.numpy as jnp
from jax import lax
from jax.experimental import pallas as pl
from jax.experimental.pallas import tpu as pltpu

LANE = 128
NEG_INF = -1e30                        # padded-class logit, folded into the bias
TILE_N_MAX = 4096                      # upper bound on token rows per grid step
VMEM_BUDGET_BYTES = 20 * 1024 * 1024   # streamed-buffer budget (safe within v7x's 64 MiB VMEM)
VMEM_LIMIT_BYTES = 40 * 1024 * 1024    # raise scoped VMEM (v5e default 16 MiB, v6e/v7x 32 MiB)


def _round_up(x, m):
    return (x + m - 1) // m * m


def _choose_tile(n, *, n_model, hidden, h_itemsize):
    """Pick a 128-multiple token tile from a VMEM budget (target 2048-4096 rows for small H)."""
    n128 = _round_up(max(n, LANE), LANE)
    per_row = (2 * n_model * hidden * h_itemsize       # h tile, double-buffered
               + 2 * LANE * 4                          # logits0 writeback, double-buffered
               + 3 * LANE * 4                          # raw logits + XLU-transpose scratch (f32)
               + (3 * n_model + 6) * 8 * 4)            # [8, TN] class-on-sublane temporaries
    budget_rows = max(VMEM_BUDGET_BYTES // per_row, LANE)
    tile_n = min(TILE_N_MAX, (budget_rows // LANE) * LANE, n128)
    if n128 >= 2 * LANE:                               # >=2 tiles so the v7x megacore gets work on both TCs
        tile_n = min(tile_n, _round_up((n128 + 1) // 2, LANE))
    tile_n = max(tile_n, LANE)
    return tile_n, _round_up(n128, tile_n)


# ----------------------------------------------------------------------------
# Fused kernel: per-model classifier head + CE + softmax + KL consistency.
# One grid step handles TILE_N tokens for all M ensemble members.
# ----------------------------------------------------------------------------
def fused_loss_kernel(h_ref, w_ref, b_ref, labels_ref, logits0_ref, partial_ref,
                      *, n_model, num_class):
    tn = h_ref.shape[1]
    cls_rows = min(_round_up(num_class, 8), w_ref.shape[2])   # sublanes kept after compaction

    labels = labels_ref[...]                                  # [1, TN] int32 (lane-major)
    maskf = (labels != -1).astype(jnp.float32)                # [1, TN]
    lab = jnp.maximum(labels, 0)                              # [1, TN]
    cls = lax.broadcasted_iota(jnp.int32, (cls_rows, tn), 0)  # class id on sublanes
    onehot = jnp.where(cls == lab, maskf, 0.0)                # [Cr, TN] (ignore-mask folded in)

    ce_sum = jnp.float32(0.0)
    probs = []
    logps = []
    for m in range(n_model):                                  # static unroll, small M
        # Full 128-lane MXU matmul; padded-class mask is pre-folded into b_pad (-1e30),
        # so no per-model iota/select on the [TN,128] result.
        raw = jnp.dot(h_ref[m], w_ref[m],
                      preferred_element_type=jnp.float32) + b_ref[m]      # [TN, 128]
        if m == 0:
            logits0_ref[...] = raw                            # lane-dense store; sliced to C outside
        # Class-on-sublane compaction: XLU transpose + sublane slice so softmax/CE/KL math
        # runs on [Cr, TN] instead of [TN, 128] (~16x fewer VPU/EUP elements); the transpose
        # lands in the otherwise-idle XLU slot.
        lg = jnp.transpose(raw)[:cls_rows, :]                 # [Cr, TN]; padded rows ~ -1e30
        mx = jnp.max(lg, axis=0, keepdims=True)               # [1, TN]
        ex = jnp.exp(lg - mx)                                  # padded rows underflow to exactly 0
        se = jnp.sum(ex, axis=0, keepdims=True)                # [1, TN]
        lse = mx + jnp.log(se)                                 # [1, TN]
        # CE: ignored rows contribute 0 (mask already inside maskf / onehot).
        ce_sum = ce_sum + jnp.sum(maskf * lse) - jnp.sum(onehot * lg)
        inv_se = pl.reciprocal(se, approx=False)               # narrow [1,TN] reciprocal + bcast mul
        probs.append(ex * inv_se)                              # [Cr, TN]; padded rows exactly 0
        logps.append(lg - lse)                                 # reuse log-softmax for the KL cross term

    avg = probs[0]
    for m in range(1, n_model):
        avg = avg + probs[m]
    avg = avg * jnp.float32(1.0 / n_model)                     # [Cr, TN]

    # sum_m KL(avg || p_m) = M * sum_c avg*log(avg+eps) - sum_m sum_c avg*log_softmax_m
    ent = jnp.sum(avg * jnp.log(avg + 1e-5), axis=0, keepdims=True)        # [1, TN]
    cross = jnp.zeros((1, tn), jnp.float32)
    for m in range(n_model):
        cross = cross + jnp.sum(avg * logps[m], axis=0, keepdims=True)
    reg_sum = jnp.sum((n_model * ent - cross) * maskf)
    mask_sum = jnp.sum(maskf)

    # Per-tile partial sums packed into one full (8, 128) block (unmasked store).
    sub = lax.broadcasted_iota(jnp.int32, (8, LANE), 0)
    lane = lax.broadcasted_iota(jnp.int32, (8, LANE), 1)
    slot = sub * LANE + lane
    partial_ref[0] = (jnp.where(slot == 0, ce_sum, 0.0)
                      + jnp.where(slot == 1, reg_sum, 0.0)
                      + jnp.where(slot == 2, mask_sum, 0.0))


def fused_loss_call(h, w_pad, b_pad, labels_row, *, num_class, tile_n):
    m, n, hdim = h.shape
    cp = w_pad.shape[-1]
    num_tiles = n // tile_n
    kern = functools.partial(fused_loss_kernel, n_model=m, num_class=num_class)
    cost = pl.CostEstimate(
        flops=2 * m * n * hdim * cp + 60 * m * n * 8,
        transcendentals=n * (9 * m + 8),
        bytes_accessed=(h.dtype.itemsize * m * n * hdim + 4 * n * cp + 4 * n
                        + num_tiles * (w_pad.dtype.itemsize * m * hdim * cp
                                       + 4 * m * cp + 4 * 8 * LANE)),
    )
    return pl.pallas_call(
        kern,
        out_shape=(jax.ShapeDtypeStruct((n, cp), jnp.float32),
                   jax.ShapeDtypeStruct((num_tiles, 8, LANE), jnp.float32)),
        grid_spec=pltpu.PrefetchScalarGridSpec(
            num_scalar_prefetch=0,
            grid=(num_tiles,),
            in_specs=[
                pl.BlockSpec((m, tile_n, hdim), lambda i: (0, i, 0)),   # streamed h tile (bf16)
                pl.BlockSpec((m, hdim, cp), lambda i: (0, 0, 0)),       # W resident in VMEM
                pl.BlockSpec((m, 1, cp), lambda i: (0, 0, 0)),          # b (+pad mask) resident
                pl.BlockSpec((1, tile_n), lambda i: (0, i)),            # labels tile, lane-major
            ],
            out_specs=[
                pl.BlockSpec((tile_n, cp), lambda i: (i, 0)),           # model-0 logits, lane-dense
                pl.BlockSpec((1, 8, LANE), lambda i: (i, 0, 0)),        # per-tile partial sums
            ],
        ),
        compiler_params=pltpu.CompilerParams(
            dimension_semantics=("parallel",),                          # megacore-shard the N tiles
            vmem_limit_bytes=VMEM_LIMIT_BYTES),
        cost_estimate=cost,
    )(h, w_pad, b_pad, labels_row)


# ----------------------------------------------------------------------------
# Inference path (labels=None): model-0 classifier head only, N-tiled.
# ----------------------------------------------------------------------------
def classifier0_kernel(h_ref, w_ref, b_ref, o_ref):
    o_ref[...] = (jnp.dot(h_ref[...], w_ref[...],
                          preferred_element_type=jnp.float32) + b_ref[...])


def classifier0_call(h0, w0, b0, *, tile_n):
    n, hdim = h0.shape
    cp = w0.shape[-1]
    num_tiles = n // tile_n
    return pl.pallas_call(
        classifier0_kernel,
        out_shape=jax.ShapeDtypeStruct((n, cp), jnp.float32),
        grid_spec=pltpu.PrefetchScalarGridSpec(
            num_scalar_prefetch=0,
            grid=(num_tiles,),
            in_specs=[
                pl.BlockSpec((tile_n, hdim), lambda i: (i, 0)),
                pl.BlockSpec((hdim, cp), lambda i: (0, 0)),
                pl.BlockSpec((1, cp), lambda i: (0, 0)),
            ],
            out_specs=pl.BlockSpec((tile_n, cp), lambda i: (i, 0)),
        ),
        compiler_params=pltpu.CompilerParams(
            dimension_semantics=("parallel",),
            vmem_limit_bytes=VMEM_LIMIT_BYTES),
    )(h0, w0, b0)


# ----------------------------------------------------------------------------
# NLLModel wrapper (parameter setup / padding / tiny final reductions in plain JAX)
# ----------------------------------------------------------------------------
class NLLModelPallas:
    def __init__(self, *, n_model=2, vocab=50, hidden=32, num_class=4,
                 alpha_t=0.5, seed=0, input_dtype=jnp.bfloat16):
        self.n_model = n_model
        self.num_class = num_class
        self.alpha_t = alpha_t
        self.input_dtype = input_dtype             # h / W stream dtype (bf16 halves h HBM read)
        self.cp = _round_up(num_class, LANE)       # keep 128 (matches v5e MXU, unmasked stores)
        key = jax.random.PRNGKey(seed)
        keys = jax.random.split(key, 3 * n_model)
        emb, w, b = [], [], []
        for i in range(n_model):
            emb.append(0.1 * jax.random.normal(keys[3 * i], (vocab, hidden), jnp.float32))
            # PyTorch nn.Linear weight is [C, H]; store transposed [H, C].
            w.append(0.1 * jax.random.normal(keys[3 * i + 1], (hidden, num_class), jnp.float32))
            b.append(0.1 * jax.random.normal(keys[3 * i + 2], (num_class,), jnp.float32))
        self.emb = jnp.stack(emb)                                   # [M, V, H] f32
        w = jnp.stack(w)                                            # [M, H, C]
        b = jnp.stack(b)[:, None, :]                                # [M, 1, C]
        # Pad classifier to a full 128-lane output ONCE at init.  The padded-lane softmax
        # mask is folded into the bias (-1e30): no per-model select inside the kernel; the
        # padded logits0 columns are sliced off outside, so semantics are unchanged.
        self.w_pad = (jnp.zeros((n_model, hidden, self.cp), self.input_dtype)
                      .at[..., :num_class].set(w.astype(self.input_dtype)))
        self.b_pad = (jnp.full((n_model, 1, self.cp), NEG_INF, jnp.float32)
                      .at[..., :num_class].set(b))

    def _hidden(self, input_ids, attention_mask):
        # Stand-in for the (untranslatable) LoRA transformer backbone.
        am = attention_mask.astype(jnp.float32)[None, :, :, None]   # [1, B, L, 1]
        h = self.emb[:, input_ids, :] * am                          # [M, B, L, H]
        m, bsz, seq, hd = h.shape
        return h.reshape(m, bsz * seq, hd).astype(self.input_dtype)

    def __call__(self, input_ids, attention_mask, labels=None):
        h = self._hidden(input_ids, attention_mask)                 # [M, N, H] bf16
        m, n, hd = h.shape
        tile_n, n_pad = _choose_tile(
            n, n_model=m, hidden=hd,
            h_itemsize=jnp.dtype(self.input_dtype).itemsize)

        if labels is None:                                          # inference: model 0 only
            h0 = h[0]
            if n_pad != n:
                h0 = jnp.pad(h0, ((0, n_pad - n), (0, 0)))
            logits0 = classifier0_call(h0, self.w_pad[0], self.b_pad[0], tile_n=tile_n)
            return (logits0[:n, :self.num_class],)

        labels_flat = labels.reshape(-1).astype(jnp.int32)
        if n_pad != n:
            h = jnp.pad(h, ((0, 0), (0, n_pad - n), (0, 0)))
            labels_flat = jnp.pad(labels_flat, (0, n_pad - n), constant_values=-1)
        labels_row = labels_flat.reshape(1, -1)                     # lane-major labels

        logits0_pad, partials = fused_loss_call(
            h, self.w_pad, self.b_pad, labels_row,
            num_class=self.num_class, tile_n=tile_n)

        totals = jnp.sum(partials, axis=0).reshape(-1)              # tiny reduce in JAX
        ce_sum, reg_sum, mask_sum = totals[0], totals[1], totals[2]
        ce_loss = ce_sum / (mask_sum * self.n_model)                # mean over models of masked-mean CE
        reg_loss = (reg_sum / self.n_model) / (mask_sum + 0.001)
        # alpha_t combined outside the kernel: annealing it never recompiles the kernel.
        loss = ce_loss + self.alpha_t * reg_loss
        logits0 = logits0_pad[:n, :self.num_class]
        return (loss, logits0)


# ----------------------------------------------------------------------------
# Pure-JAX reference of the PyTorch NLLModel loss (for correctness check)
# ----------------------------------------------------------------------------
def _reference(h, w, b, labels_flat, alpha_t):
    m = h.shape[0]
    logits = jnp.einsum("mnh,mhc->mnc", h, w) + b                   # [M, N, C]
    maskf = (labels_flat != -1).astype(jnp.float32)                 # [N]
    lab = jnp.maximum(labels_flat, 0)
    logp = jax.nn.log_softmax(logits, axis=-1)
    nll = -jnp.take_along_axis(logp, lab[None, :, None], axis=-1)[..., 0]    # [M, N]
    ce = jnp.sum(nll * maskf[None], axis=-1) / jnp.sum(maskf)
    loss_ce = jnp.mean(ce)
    probs = jax.nn.softmax(logits, axis=-1)
    avg = jnp.mean(probs, axis=0)                                   # [N, C]
    kl = jnp.sum(avg[None] * (jnp.log(avg + 1e-5)[None] - jnp.log(probs + 1e-5)),
                 axis=-1)                                           # [M, N]
    reg = jnp.sum(jnp.sum(kl * maskf[None], axis=0) / m) / (jnp.sum(maskf) + 0.001)
    return loss_ce + alpha_t * reg, logits[0]


if __name__ == "__main__":
    B, L, H, C, M, V = 2, 8, 32, 4, 2, 50

    key = jax.random.PRNGKey(0)
    k_ids, k_lab = jax.random.split(key)
    input_ids = jax.random.randint(k_ids, (B, L), 0, V, dtype=jnp.int32)
    attention_mask = jnp.ones((B, L), dtype=jnp.int32)
    labels = jax.random.randint(k_lab, (B, L), 0, C, dtype=jnp.int32)
    labels = labels.at[:, -2:].set(-1)          # emulate ignored (padding) positions

    model = NLLModelPallas(n_model=M, vocab=V, hidden=H, num_class=C,
                           alpha_t=0.5, seed=0)

    # training path (loss + model-0 logits)
    loss, logits0 = model(input_ids, attention_mask, labels)
    jax.block_until_ready(loss)
    jax.block_until_ready(logits0)
    assert logits0.shape == (B * L, C)
    assert loss.shape == ()

    # inference path (model-0 logits only)
    (logits_inf,) = model(input_ids, attention_mask)
    jax.block_until_ready(logits_inf)
    assert logits_inf.shape == (B * L, C)

    # correctness vs pure-JAX reference of the PyTorch math (same bf16-rounded params/h)
    h_ref = model._hidden(input_ids, attention_mask).astype(jnp.float32)
    w_ref = model.w_pad[..., :C].astype(jnp.float32)
    b_ref = model.b_pad[..., :C]                                    # real bias lanes (f32)
    ref_loss, ref_logits0 = _reference(h_ref, w_ref, b_ref,
                                       labels.reshape(-1).astype(jnp.int32), 0.5)
    assert jnp.allclose(loss, ref_loss, rtol=2e-3, atol=2e-3)
    assert jnp.allclose(logits0, ref_logits0, rtol=2e-3, atol=2e-3)
    assert jnp.allclose(logits_inf, ref_logits0, rtol=2e-3, atol=2e-3)

    print("KERNEL_OK")
</pallas_src>

<mosaic_0001>
module attributes {stable_mosaic.version = 11 : i64} {
  func.func @fused_loss_kernel(%arg0: i32, %arg1: memref<2x128x32xbf16, #tpu.memory_space<vmem>>, %arg2: memref<2x32x128xbf16, #tpu.memory_space<vmem>>, %arg3: memref<2x1x128xf32, #tpu.memory_space<vmem>>, %arg4: memref<1x128xi32, #tpu.memory_space<vmem>>, %arg5: memref<128x128xf32, #tpu.memory_space<vmem>>, %arg6: memref<1x8x128xf32, #tpu.memory_space<vmem>>) attributes {dimension_semantics = [#tpu.dimension_semantics<parallel>], iteration_bounds = array<i64: 1>, scalar_prefetch = 0 : i64, scratch_operands = 0 : i64, tpu.core_type = #tpu.core_type<tc>, window_params = [{transform_indices = @transform_0, window_bounds = array<i64: 2, 128, 32>}, {pipeline_mode = #tpu.pipeline_mode<synchronous>, transform_indices = @transform_1, window_bounds = array<i64: 2, 32, 128>}, {pipeline_mode = #tpu.pipeline_mode<synchronous>, transform_indices = @transform_2, window_bounds = array<i64: 2, 1, 128>}, {transform_indices = @transform_3, window_bounds = array<i64: 1, 128>}, {transform_indices = @transform_4, window_bounds = array<i64: 128, 128>}, {transform_indices = @transform_5, window_bounds = array<i64: 1, 8, 128>}]} {
    %c0 = arith.constant 0 : index
    %c0_0 = arith.constant 0 : index
    %0 = vector.load %arg4[%c0, %c0_0] : memref<1x128xi32, #tpu.memory_space<vmem>>, vector<1x128xi32>
    %c-1_i32 = arith.constant -1 : i32
    %1 = vector.broadcast %c-1_i32 : i32 to vector<1x128xi32>
    %2 = arith.cmpi ne, %0, %1 : vector<1x128xi32>
    %3 = arith.extui %2 : vector<1x128xi1> to vector<1x128xi32>
    %4 = arith.sitofp %3 : vector<1x128xi32> to vector<1x128xf32>
    %c0_i32 = arith.constant 0 : i32
    %5 = vector.broadcast %c0_i32 : i32 to vector<1x128xi32>
    %6 = arith.maxsi %0, %5 : vector<1x128xi32>
    %7 = tpu.iota {dimensions = array<i32: 0>} : vector<8x128xi32>
    %8 = vector.broadcast %6 : vector<1x128xi32> to vector<8x128xi32>
    %9 = arith.cmpi eq, %7, %8 : vector<8x128xi32>
    %cst = arith.constant 0.000000e+00 : f32
    %10 = vector.shape_cast %4 : vector<1x128xf32> to vector<1x128xf32>
    %11 = vector.broadcast %10 : vector<1x128xf32> to vector<8x128xf32>
    %12 = vector.broadcast %cst : f32 to vector<8x128xf32>
    %13 = arith.select %9, %11, %12 : vector<8x128xi1>, vector<8x128xf32>
    %c0_1 = arith.constant 0 : index
    %c0_2 = arith.constant 0 : index
    %c0_3 = arith.constant 0 : index
    %14 = vector.load %arg1[%c0_1, %c0_2, %c0_3] : memref<2x128x32xbf16, #tpu.memory_space<vmem>>, vector<1x128x32xbf16>
    %15 = vector.shape_cast %14 : vector<1x128x32xbf16> to vector<128x32xbf16>
    %c0_4 = arith.constant 0 : index
    %c0_5 = arith.constant 0 : index
    %c0_6 = arith.constant 0 : index
    %16 = vector.load %arg2[%c0_4, %c0_5, %c0_6] : memref<2x32x128xbf16, #tpu.memory_space<vmem>>, vector<1x32x128xbf16>
    %17 = vector.shape_cast %16 : vector<1x32x128xbf16> to vector<32x128xbf16>
    %cst_7 = arith.constant dense<0.000000e+00> : vector<128x128xf32>
    %18 = tpu.matmul %15, %17, %cst_7 {dimension_numbers = #tpu.dot_dimension_numbers<[1], [0], [0], [1], [0, 0, 1, 1], [], []>} : vector<128x32xbf16>, vector<32x128xbf16>, vector<128x128xf32> -> vector<128x128xf32>
    %c0_8 = arith.constant 0 : index
    %c0_9 = arith.constant 0 : index
    %c0_10 = arith.constant 0 : index
    %19 = vector.load %arg3[%c0_8, %c0_9, %c0_10] : memref<2x1x128xf32, #tpu.memory_space<vmem>>, vector<1x1x128xf32>
    %20 = vector.shape_cast %19 : vector<1x1x128xf32> to vector<1x128xf32>
    %21 = vector.broadcast %20 : vector<1x128xf32> to vector<128x128xf32>
    %22 = arith.addf %18, %21 : vector<128x128xf32>
    %c0_11 = arith.constant 0 : index
    %c0_12 = arith.constant 0 : index
    %23 = vector.load %arg5[%c0_11, %c0_12] : memref<128x128xf32, #tpu.memory_space<vmem>>, vector<128x128xf32>
    tpu.vector_store %arg5[%c0_11, %c0_12], %22 {strides = array<i32>} : memref<128x128xf32, #tpu.memory_space<vmem>>, vector<128x128xf32>,
    %24 = tpu.transpose %22, [1, 0] : vector<128x128xf32> -> vector<128x128xf32>
    %25 = vector.extract_strided_slice %24 {offsets = [0, 0], sizes = [8, 128], strides = [1, 1]} : vector<128x128xf32> to vector<8x128xf32>
    %cst_13 = arith.constant dense<0xFF800000> : vector<128xf32>
    %26 = vector.multi_reduction <maximumf>, %25, %cst_13 [0] : vector<8x128xf32> to vector<128xf32>
    %27 = vector.shape_cast %26 : vector<128xf32> to vector<1x128xf32>
    %28 = vector.broadcast %27 : vector<1x128xf32> to vector<8x128xf32>
    %29 = arith.subf %25, %28 : vector<8x128xf32>
    %30 = math.exp %29 : vector<8x128xf32>
    %cst_14 = arith.constant dense<0.000000e+00> : vector<128xf32>
    %31 = vector.multi_reduction <add>, %30, %cst_14 [0] : vector<8x128xf32> to vector<128xf32>
    %32 = vector.shape_cast %31 : vector<128xf32> to vector<1x128xf32>
    %33 = math.log %32 : vector<1x128xf32>
    %34 = arith.addf %27, %33 : vector<1x128xf32>
    %35 = arith.mulf %4, %34 : vector<1x128xf32>
    %36 = vector.shape_cast %35 : vector<1x128xf32> to vector<1x1x128xf32>
    %cst_15 = arith.constant dense<0.000000e+00> : vector<1xf32>
    %37 = vector.multi_reduction <add>, %36, %cst_15 [1, 2] : vector<1x1x128xf32> to vector<1xf32>
    %38 = vector.shape_cast %37 : vector<1xf32> to vector<1x1x1xf32>
    %39 = vector.extract %38[0, 0, 0] : f32 from vector<1x1x1xf32>
    %cst_16 = arith.constant 0.000000e+00 : f32
    %40 = arith.addf %cst_16, %39 : f32
    %41 = arith.mulf %13, %25 : vector<8x128xf32>
    %42 = vector.shape_cast %41 : vector<8x128xf32> to vector<1x8x128xf32>
    %cst_17 = arith.constant dense<0.000000e+00> : vector<1xf32>
    %43 = vector.multi_reduction <add>, %42, %cst_17 [1, 2] : vector<1x8x128xf32> to vector<1xf32>
    %44 = vector.shape_cast %43 : vector<1xf32> to vector<1x1x1xf32>
    %45 = vector.extract %44[0, 0, 0] : f32 from vector<1x1x1xf32>
    %46 = arith.subf %40, %45 : f32
    %47 = tpu.reciprocal %32 : vector<1x128xf32> -> vector<1x128xf32>
    %48 = vector.broadcast %47 : vector<1x128xf32> to vector<8x128xf32>
    %49 = arith.mulf %30, %48 : vector<8x128xf32>
    %50 = vector.broadcast %34 : vector<1x128xf32> to vector<8x128xf32>
    %51 = arith.subf %25, %50 : vector<8x128xf32>
    %c1 = arith.constant 1 : index
    %c0_18 = arith.constant 0 : index
    %c0_19 = arith.constant 0 : index
    %52 = vector.load %arg1[%c1, %c0_18, %c0_19] : memref<2x128x32xbf16, #tpu.memory_space<vmem>>, vector<1x128x32xbf16>
    %53 = vector.shape_cast %52 : vector<1x128x32xbf16> to vector<128x32xbf16>
    %c1_20 = arith.constant 1 : index
    %c0_21 = arith.constant 0 : index
    %c0_22 = arith.constant 0 : index
    %54 = vector.load %arg2[%c1_20, %c0_21, %c0_22] : memref<2x32x128xbf16, #tpu.memory_space<vmem>>, vector<1x32x128xbf16>
    %55 = vector.shape_cast %54 : vector<1x32x128xbf16> to vector<32x128xbf16>
    %cst_23 = arith.constant dense<0.000000e+00> : vector<128x128xf32>
    %56 = tpu.matmul %53, %55, %cst_23 {dimension_numbers = #tpu.dot_dimension_numbers<[1], [0], [0], [1], [0, 0, 1, 1], [], []>} : vector<128x32xbf16>, vector<32x128xbf16>, vector<128x128xf32> -> vector<128x128xf32>
    %c1_24 = arith.constant 1 : index
    %c0_25 = arith.constant 0 : index
    %c0_26 = arith.constant 0 : index
    %57 = vector.load %arg3[%c1_24, %c0_25, %c0_26] : memref<2x1x128xf32, #tpu.memory_space<vmem>>, vector<1x1x128xf32>
    %58 = vector.shape_cast %57 : vector<1x1x128xf32> to vector<1x128xf32>
    %59 = vector.broadcast %58 : vector<1x128xf32> to vector<128x128xf32>
    %60 = arith.addf %56, %59 : vector<128x128xf32>
    %61 = tpu.transpose %60, [1, 0] : vector<128x128xf32> -> vector<128x128xf32>
    %62 = vector.extract_strided_slice %61 {offsets = [0, 0], sizes = [8, 128], strides = [1, 1]} : vector<128x128xf32> to vector<8x128xf32>
    %cst_27 = arith.constant dense<0xFF800000> : vector<128xf32>
    %63 = vector.multi_reduction <maximumf>, %62, %cst_27 [0] : vector<8x128xf32> to vector<128xf32>
    %64 = vector.shape_cast %63 : vector<128xf32> to vector<1x128xf32>
    %65 = vector.broadcast %64 : vector<1x128xf32> to vector<8x128xf32>
    %66 = arith.subf %62, %65 : vector<8x128xf32>
    %67 = math.exp %66 : vector<8x128xf32>
    %cst_28 = arith.constant dense<0.000000e+00> : vector<128xf32>
    %68 = vector.multi_reduction <add>, %67, %cst_28 [0] : vector<8x128xf32> to vector<128xf32>
    %69 = vector.shape_cast %68 : vector<128xf32> to vector<1x128xf32>
    %70 = math.log %69 : vector<1x128xf32>
    %71 = arith.addf %64, %70 : vector<1x128xf32>
    %72 = arith.mulf %4, %71 : vector<1x128xf32>
    %73 = vector.shape_cast %72 : vector<1x128xf32> to vector<1x1x128xf32>
    %cst_29 = arith.constant dense<0.000000e+00> : vector<1xf32>
    %74 = vector.multi_reduction <add>, %73, %cst_29 [1, 2] : vector<1x1x128xf32> to vector<1xf32>
    %75 = vector.shape_cast %74 : vector<1xf32> to vector<1x1x1xf32>
    %76 = vector.extract %75[0, 0, 0] : f32 from vector<1x1x1xf32>
    %77 = arith.addf %46, %76 : f32
    %78 = arith.mulf %13, %62 : vector<8x128xf32>
    %79 = vector.shape_cast %78 : vector<8x128xf32> to vector<1x8x128xf32>
    %cst_30 = arith.constant dense<0.000000e+00> : vector<1xf32>
    %80 = vector.multi_reduction <add>, %79, %cst_30 [1, 2] : vector<1x8x128xf32> to vector<1xf32>
    %81 = vector.shape_cast %80 : vector<1xf32> to vector<1x1x1xf32>
    %82 = vector.extract %81[0, 0, 0] : f32 from vector<1x1x1xf32>
    %83 = arith.subf %77, %82 : f32
    %84 = tpu.reciprocal %69 : vector<1x128xf32> -> vector<1x128xf32>
    %85 = vector.broadcast %84 : vector<1x128xf32> to vector<8x128xf32>
    %86 = arith.mulf %67, %85 : vector<8x128xf32>
    %87 = vector.broadcast %71 : vector<1x128xf32> to vector<8x128xf32>
    %88 = arith.subf %62, %87 : vector<8x128xf32>
    %89 = arith.addf %49, %86 : vector<8x128xf32>
    %cst_31 = arith.constant 5.000000e-01 : f32
    %90 = vector.broadcast %cst_31 : f32 to vector<8x128xf32>
    %91 = arith.mulf %89, %90 : vector<8x128xf32>
    %cst_32 = arith.constant 9.99999974E-6 : f32
    %92 = vector.broadcast %cst_32 : f32 to vector<8x128xf32>
    %93 = arith.addf %91, %92 : vector<8x128xf32>
    %94 = math.log %93 : vector<8x128xf32>
    %95 = arith.mulf %91, %94 : vector<8x128xf32>
    %cst_33 = arith.constant dense<0.000000e+00> : vector<128xf32>
    %96 = vector.multi_reduction <add>, %95, %cst_33 [0] : vector<8x128xf32> to vector<128xf32>
    %97 = vector.shape_cast %96 : vector<128xf32> to vector<1x128xf32>
    %cst_34 = arith.constant 0.000000e+00 : f32
    %98 = vector.broadcast %cst_34 : f32 to vector<1x128xf32>
    %99 = arith.mulf %91, %51 : vector<8x128xf32>
    %cst_35 = arith.constant dense<0.000000e+00> : vector<128xf32>
    %100 = vector.multi_reduction <add>, %99, %cst_35 [0] : vector<8x128xf32> to vector<128xf32>
    %101 = vector.shape_cast %100 : vector<128xf32> to vector<1x128xf32>
    %102 = arith.addf %98, %101 : vector<1x128xf32>
    %103 = arith.mulf %91, %88 : vector<8x128xf32>
    %cst_36 = arith.constant dense<0.000000e+00> : vector<128xf32>
    %104 = vector.multi_reduction <add>, %103, %cst_36 [0] : vector<8x128xf32> to vector<128xf32>
    %105 = vector.shape_cast %104 : vector<128xf32> to vector<1x128xf32>
    %106 = arith.addf %102, %105 : vector<1x128xf32>
    %cst_37 = arith.constant 2.000000e+00 : f32
    %107 = vector.broadcast %cst_37 : f32 to vector<1x128xf32>
    %108 = arith.mulf %107, %97 : vector<1x128xf32>
    %109 = arith.subf %108, %106 : vector<1x128xf32>
    %110 = arith.mulf %109, %4 : vector<1x128xf32>
    %111 = vector.shape_cast %110 : vector<1x128xf32> to vector<1x1x128xf32>
    %cst_38 = arith.constant dense<0.000000e+00> : vector<1xf32>
    %112 = vector.multi_reduction <add>, %111, %cst_38 [1, 2] : vector<1x1x128xf32> to vector<1xf32>
    %113 = vector.shape_cast %112 : vector<1xf32> to vector<1x1x1xf32>
    %114 = vector.extract %113[0, 0, 0] : f32 from vector<1x1x1xf32>
    %115 = vector.shape_cast %4 : vector<1x128xf32> to vector<1x1x128xf32>
    %cst_39 = arith.constant dense<0.000000e+00> : vector<1xf32>
    %116 = vector.multi_reduction <add>, %115, %cst_39 [1, 2] : vector<1x1x128xf32> to vector<1xf32>
    %117 = vector.shape_cast %116 : vector<1xf32> to vector<1x1x1xf32>
    %118 = vector.extract %117[0, 0, 0] : f32 from vector<1x1x1xf32>
    %119 = tpu.iota {dimensions = array<i32: 0>} : vector<8x128xi32>
    %120 = tpu.iota {dimensions = array<i32: 1>} : vector<8x128xi32>
    %c128_i32 = arith.constant 128 : i32
    %121 = vector.broadcast %c128_i32 : i32 to vector<8x128xi32>
    %122 = arith.muli %119, %121 : vector<8x128xi32>
    %123 = arith.addi %122, %120 : vector<8x128xi32>
    %c0_i32_40 = arith.constant 0 : i32
    %124 = vector.broadcast %c0_i32_40 : i32 to vector<8x128xi32>
    %125 = arith.cmpi eq, %123, %124 : vector<8x128xi32>
    %cst_41 = arith.constant 0.000000e+00 : f32
    %126 = vector.broadcast %83 : f32 to vector<8x128xf32>
    %127 = vector.broadcast %cst_41 : f32 to vector<8x128xf32>
    %128 = arith.select %125, %126, %127 : vector<8x128xi1>, vector<8x128xf32>
    %c1_i32 = arith.constant 1 : i32
    %129 = vector.broadcast %c1_i32 : i32 to vector<8x128xi32>
    %130 = arith.cmpi eq, %123, %129 : vector<8x128xi32>
    %cst_42 = arith.constant 0.000000e+00 : f32
    %131 = vector.broadcast %114 : f32 to vector<8x128xf32>
    %132 = vector.broadcast %cst_42 : f32 to vector<8x128xf32>
    %133 = arith.select %130, %131, %132 : vector<8x128xi1>, vector<8x128xf32>
    %134 = arith.addf %128, %133 : vector<8x128xf32>
    %c2_i32 = arith.constant 2 : i32
    %135 = vector.broadcast %c2_i32 : i32 to vector<8x128xi32>
    %136 = arith.cmpi eq, %123, %135 : vector<8x128xi32>
    %cst_43 = arith.constant 0.000000e+00 : f32
    %137 = vector.broadcast %118 : f32 to vector<8x128xf32>
    %138 = vector.broadcast %cst_43 : f32 to vector<8x128xf32>
    %139 = arith.select %136, %137, %138 : vector<8x128xi1>, vector<8x128xf32>
    %140 = arith.addf %134, %139 : vector<8x128xf32>
    %c0_44 = arith.constant 0 : index
    %c0_45 = arith.constant 0 : index
    %c0_46 = arith.constant 0 : index
    %141 = vector.load %arg6[%c0_44, %c0_45, %c0_46] : memref<1x8x128xf32, #tpu.memory_space<vmem>>, vector<1x8x128xf32>
    %142 = vector.shape_cast %141 : vector<1x8x128xf32> to vector<8x128xf32>
    %143 = vector.shape_cast %140 : vector<8x128xf32> to vector<1x8x128xf32>
    tpu.vector_store %arg6[%c0_44, %c0_45, %c0_46], %143 {strides = array<i32>} : memref<1x8x128xf32, #tpu.memory_space<vmem>>, vector<1x8x128xf32>,
    return
  }
  func.func @transform_0(%arg0: i32) -> (i32, i32, i32) {
    %c0_i32 = arith.constant 0 : i32
    %c0_i32_0 = arith.constant 0 : i32
    %c0_i32_1 = arith.constant 0 : i32
    return %c0_i32, %arg0, %c0_i32_0 : i32, i32, i32
  }
  func.func @transform_1(%arg0: i32) -> (i32, i32, i32) {
    %c0_i32 = arith.constant 0 : i32
    %c0_i32_0 = arith.constant 0 : i32
    %c0_i32_1 = arith.constant 0 : i32
    %c0_i32_2 = arith.constant 0 : i32
    return %c0_i32, %c0_i32_0, %c0_i32_1 : i32, i32, i32
  }
  func.func @transform_2(%arg0: i32) -> (i32, i32, i32) {
    %c0_i32 = arith.constant 0 : i32
    %c0_i32_0 = arith.constant 0 : i32
    %c0_i32_1 = arith.constant 0 : i32
    %c0_i32_2 = arith.constant 0 : i32
    return %c0_i32, %c0_i32_0, %c0_i32_1 : i32, i32, i32
  }
  func.func @transform_3(%arg0: i32) -> (i32, i32) {
    %c0_i32 = arith.constant 0 : i32
    %c0_i32_0 = arith.constant 0 : i32
    return %c0_i32, %arg0 : i32, i32
  }
  func.func @transform_4(%arg0: i32) -> (i32, i32) {
    %c0_i32 = arith.constant 0 : i32
    %c0_i32_0 = arith.constant 0 : i32
    return %arg0, %c0_i32 : i32, i32
  }
  func.func @transform_5(%arg0: i32) -> (i32, i32, i32) {
    %c0_i32 = arith.constant 0 : i32
    %c0_i32_0 = arith.constant 0 : i32
    %c0_i32_1 = arith.constant 0 : i32
    return %arg0, %c0_i32, %c0_i32_0 : i32, i32, i32
  }
}

</mosaic_0001>

<bundles_post_ra>
// kernel: tpu_custom_call.1
= control target key start
LH: loop header
LB: loop body
LE: loop exit
PB: predicated region body
PF: predicated region fallthrough
CT: control target
= control target key end

     0   :  { %11 = vsyncpa [#allocation3], 0  ;;  %s1054_s0 = inlined_call_operand.vmem [shape: bf16[2,128,32], index: 0, kind: input, shape index: {}]   ;;  %s1055_s1 = inlined_call_operand.vmem [shape: bf16[2,32,128], index: 1, kind: input, shape index: {}]   ;;  %s1056_s2 = inlined_call_operand.vmem [shape: f32[2,1,128], index: 2, kind: input, shape index: {}]   ;;  %s1057_s3 = inlined_call_operand.vmem [shape: s32[1,128], index: 3, kind: input, shape index: {}]   ;;  %s1058_s4 = inlined_call_operand.hbm [shape: f32[128,128], index: 4, kind: output, shape index: {0}]   ;;  %s1059_s5 = inlined_call_operand.hbm [shape: f32[1,8,128], index: 5, kind: output, shape index: {1}]  }
   0x1   :  { %v761_v0 = vld [vmem:[%s1055_s1 + $0x8] sm:$0xff]  ;;  %v771_v1 = vld [vmem:[%s1055_s1 + $0x18] sm:$0xff]  ;;  %v760_v2 = vld [vmem:[%s1055_s1] sm:$0xff] }
   0x2   :  { %143 = vmatpush.bf16.msra.mxu0 %v761_v0  ;;  %401 = vmatpush.bf16.msra.mxu1 %v771_v1  ;;  %v770_v3 = vld [vmem:[%s1055_s1 + $0x10] sm:$0xff] }
   0x3   :  { %772 = vmatpush.bf16.msra.mxu2 %v761_v0  ;;  %774 = vmatpush.bf16.msra.mxu3 %v771_v1 }
   0x4   :  { %12 = vsyncpa [#allocation5], 0  ;;  %v752_v4 = vld [vmem:[%s1054_s0] sm:$0xff]  ;;  %vm112_vm0 = vcmask 261120   ;;  %v753_v6 = vld [vmem:[%s1054_s0 + $0x8] sm:$0xff]  ;;  %vm253_vm4 = vcmask 1040384  }
   0x5   :  { %v762_v5 = vld [vmem:[%s1054_s0 + $0x40] sm:$0xff]  ;;  %v763_v7 = vld [vmem:[%s1054_s0 + $0x48] sm:$0xff]  ;;  %v754_v10 = vld [vmem:[%s1054_s0 + $0x10] sm:$0xff]  ;;  %s606_s13 = sshll.u32 %s1058_s4, 4  ;;  %s863_s14 = smov 128   ;;  %s607_s13 = int_to_ptr.hbm [resolvable:$true] %s606_s13 }
   0x6   :  { %144 = vmatpush.bf16.msra.mxu0 %v760_v2  ;;  %402 = vmatpush.bf16.msra.mxu1 %v770_v3  ;;  %v756_v8 = vld [vmem:[%s1054_s0 + $0x20] sm:$0xff]  ;;  %v764_v11 = vld [vmem:[%s1054_s0 + $0x50] sm:$0xff]  ;;  %v757_v12 = vld [vmem:[%s1054_s0 + $0x28] sm:$0xff]  ;;  %s864_s15 = smov 8   ;;  %s865_s23 = smov [#allocation4]  }
   0x7   :  { %773 = vmatpush.bf16.msra.mxu2 %v760_v2  ;;  %775 = vmatpush.bf16.msra.mxu3 %v770_v3  ;;  %v766_v9 = vld [vmem:[%s1054_s0 + $0x60] sm:$0xff]  ;;  %v767_v13 = vld [vmem:[%s1054_s0 + $0x68] sm:$0xff]  ;;  %v755_v14 = vld [vmem:[%s1054_s0 + $0x18] sm:$0xff]  ;;  %s618_s24 = sshll.u32 %s865_s23, 4  ;;  %s620_s28 = sshll.u32 %s1059_s5, 4  ;;  %s619_s24 = int_to_ptr.vmem [resolvable:$true] %s618_s24  ;;  %s621_s28 = int_to_ptr.hbm [resolvable:$true] %s620_s28 }
   0x8   :  { %v765_v15 = vld [vmem:[%s1054_s0 + $0x58] sm:$0xff]  ;;  %v758_v16 = vld [vmem:[%s1054_s0 + $0x30] sm:$0xff]  ;;  %v975_v20 = vld [vmem:[%s1056_s2] ss:$0 sm:$0xff] }
   0x9   :  { %675 = vmatmul.msk.bf16.vlgmr.msra.gmra.mxu0 %vm112_vm0, %v752_v4  ;;  %744 = vmatmul.msk.bf16.vlgmr.msra.gmra.mxu1 %vm112_vm0, %v762_v5  ;;  %v768_v17 = vld [vmem:[%s1054_s0 + $0x70] sm:$0xff]  ;;  %v759_v18 = vld [vmem:[%s1054_s0 + $0x38] sm:$0xff]  ;;  %v980_v21 = vld [vmem:[%s1056_s2 + $0x1] ss:$0 sm:$0xff] }
   0xa   :  { %679 = vmatmul.msk.bf16.vlgmr.msra.gmra.mxu2 %vm112_vm0, %v756_v8  ;;  %748 = vmatmul.msk.bf16.vlgmr.msra.gmra.mxu3 %vm112_vm0, %v766_v9  ;;  %v769_v19 = vld [vmem:[%s1054_s0 + $0x78] sm:$0xff] }
  0x19   :  { %676 = vmatmul.msk.bf16.gmra.mxu0 %vm112_vm0, %v753_v6  ;;  %745 = vmatmul.msk.bf16.gmra.mxu1 %vm112_vm0, %v763_v7 }
  0x1a   :  { %680 = vmatmul.msk.bf16.gmra.mxu2 %vm112_vm0, %v757_v12  ;;  %749 = vmatmul.msk.bf16.gmra.mxu3 %vm112_vm0, %v767_v13 }
  0x29   :  { %677 = vmatmul.msk.bf16.gmra.mxu0 %vm112_vm0, %v754_v10  ;;  %746 = vmatmul.msk.bf16.gmra.mxu1 %vm112_vm0, %v764_v11 }
  0x2a   :  { %681 = vmatmul.msk.bf16.gmra.mxu2 %vm112_vm0, %v758_v16  ;;  %750 = vmatmul.msk.bf16.gmra.mxu3 %vm112_vm0, %v768_v17 }
  0x39   :  { %678 = vmatmul.msk.bf16.gmra.mxu0 %vm112_vm0, %v755_v14  ;;  %747 = vmatmul.msk.bf16.gmra.mxu1 %vm112_vm0, %v765_v15 }
  0x3a   :  { %682 = vmatmul.msk.bf16.gmra.mxu2 %vm112_vm0, %v759_v18  ;;  %751 = vmatmul.msk.bf16.gmra.mxu3 %vm112_vm0, %v769_v19 }
  0x86   :  { %v146_v22 = vpop.f32.mrf.mxu0  ;;  %v404_v23 = vpop.f32.mrf.mxu1 }
  0x87   :  { %v147_v24 = vadd.f32 %v975_v20, %v146_v22  ;;  %v405_v25 = vadd.f32 %v980_v21, %v404_v23  ;;  %v22_v23 = vld [vmem:[%s1057_s3] sm:$0x1]  ;;  %s862_s3 = smov [#allocation2]  }
  0x88   :  { %vm26_vm1 = vcmp.gt.s32.totalorder %v22_v23, 0  ;;  %vm23_vm2 = vcmp.ne.s32.totalorder %v22_v23, 4294967295  ;;  %s604_s10 = sshll.u32 %s862_s3, 4  ;;  %s605_s10 = int_to_ptr.vmem [resolvable:$true] %s604_s10 }
  0x89   :  { %186 = vst [vmem:[#allocation2] sm:$0xff] %v147_v24  ;;  %444 = vxpose.xlu1.b32.start [1/16] (narrow) %v405_v25, 8  ;;  %202 = vxpose.xlu0.b32.start [1/16] (narrow) %v147_v24, 8  ;;  %v28_v24 = vlaneseq  ;;  %v27_v25 = vsel %vm26_vm1, %v22_v23, 0 }
  0x8d   :  { %v166_v38 = vpop.f32.mrf.mxu2  ;;  %v424_v52 = vpop.f32.mrf.mxu3 }
  0x8e   :  { %v148_v26 = vpop.f32.mrf.mxu0  ;;  %v406_v27 = vpop.f32.mrf.mxu1  ;;  %v167_v39 = vadd.f32 %v975_v20, %v166_v38  ;;  %v425_v2 = vadd.f32 %v980_v21, %v424_v52 }
  0x8f   :  { %v149_v28 = vadd.f32 %v975_v20, %v148_v26  ;;  %v407_v29 = vadd.f32 %v980_v21, %v406_v27  ;;  %v861_v26 = vmov 0.0  }
  0x90   :  { %194 = vst [vmem:[#allocation2 + $0x40] sm:$0xff] %v167_v39  ;;  %v1017_v27 = vsel %vm23_vm2, 1.0, %v861_v26 }
  0x91   :  { %187 = vst [vmem:[#allocation2 + $0x8] sm:$0xff] %v149_v28  ;;  %445 = vxpose.xlu1.b32.cont [2/16] (narrow) %v407_v29, 8  ;;  %203 = vxpose.xlu0.b32.cont [2/16] (narrow) %v149_v28, 8  ;;  %v1020_v28 = vshrl.u32 %v28_v24, 7  ;;  %v30_v29 = vperm.slane %v27_v25, 0 }
  0x93   :  { %vm31_vm3 = vcmp.eq.s32.totalorder %v1020_v28, %v30_v29 }
  0x95   :  { %v168_v44 = vpop.f32.mrf.mxu2  ;;  %v426_v0 = vpop.f32.mrf.mxu3 }
  0x96   :  { %v151_v30 = vpop.f32.mrf.mxu0  ;;  %v409_v31 = vpop.f32.mrf.mxu1  ;;  %v169_v45 = vadd.f32 %v975_v20, %v168_v44  ;;  %v427_v6 = vadd.f32 %v980_v21, %v426_v0 }
  0x97   :  { %v152_v32 = vadd.f32 %v975_v20, %v151_v30  ;;  %v410_v33 = vadd.f32 %v980_v21, %v409_v31  ;;  %v33_v30 = vperm.slane %v1017_v27, 0 }
  0x98   :  { %195 = vst [vmem:[#allocation2 + $0x48] sm:$0xff] %v169_v45 }
  0x99   :  { %188 = vst [vmem:[#allocation2 + $0x10] sm:$0xff] %v152_v32  ;;  %446 = vxpose.xlu1.b32.cont [3/16] (narrow) %v410_v33, 8  ;;  %204 = vxpose.xlu0.b32.cont [3/16] (narrow) %v152_v32, 8 }
  0x9d   :  { %v171_v50 = vpop.f32.mrf.mxu2  ;;  %v429_v5 = vpop.f32.mrf.mxu3 }
  0x9e   :  { %v153_v34 = vpop.f32.mrf.mxu0  ;;  %v411_v35 = vpop.f32.mrf.mxu1  ;;  %v172_v51 = vadd.f32 %v975_v20, %v171_v50  ;;  %v430_v10 = vadd.f32 %v980_v21, %v429_v5 }
  0x9f   :  { %v154_v36 = vadd.f32 %v975_v20, %v153_v34  ;;  %v412_v37 = vadd.f32 %v980_v21, %v411_v35 }
  0xa0   :  { %196 = vst [vmem:[#allocation2 + $0x50] sm:$0xff] %v172_v51 }
  0xa1   :  { %189 = vst [vmem:[#allocation2 + $0x18] sm:$0xff] %v154_v36  ;;  %447 = vxpose.xlu1.b32.cont [4/16] (narrow) %v412_v37, 8  ;;  %205 = vxpose.xlu0.b32.cont [4/16] (narrow) %v154_v36, 8 }
  0xa5   :  { %v173_v57 = vpop.f32.mrf.mxu2  ;;  %v431_v9 = vpop.f32.mrf.mxu3 }
  0xa6   :  { %v156_v40 = vpop.f32.mrf.mxu0  ;;  %v414_v41 = vpop.f32.mrf.mxu1  ;;  %v174_v58 = vadd.f32 %v975_v20, %v173_v57  ;;  %v432_v14 = vadd.f32 %v980_v21, %v431_v9 }
  0xa7   :  { %v157_v42 = vadd.f32 %v975_v20, %v156_v40  ;;  %v415_v43 = vadd.f32 %v980_v21, %v414_v41 }
  0xa8   :  { %197 = vst [vmem:[#allocation2 + $0x58] sm:$0xff] %v174_v58 }
  0xa9   :  { %190 = vst [vmem:[#allocation2 + $0x20] sm:$0xff] %v157_v42  ;;  %448 = vxpose.xlu1.b32.cont [5/16] (narrow) %v415_v43, 8  ;;  %206 = vxpose.xlu0.b32.cont [5/16] (narrow) %v157_v42, 8 }
  0xad   :  { %v176_v63 = vpop.f32.mrf.mxu2  ;;  %v434_v13 = vpop.f32.mrf.mxu3 }
  0xae   :  { %v158_v46 = vpop.f32.mrf.mxu0  ;;  %v416_v47 = vpop.f32.mrf.mxu1  ;;  %v177_v1 = vadd.f32 %v975_v20, %v176_v63  ;;  %v435_v15 = vadd.f32 %v980_v21, %v434_v13 }
  0xaf   :  { %v159_v48 = vadd.f32 %v975_v20, %v158_v46  ;;  %v417_v49 = vadd.f32 %v980_v21, %v416_v47 }
  0xb0   :  { %198 = vst [vmem:[#allocation2 + $0x60] sm:$0xff] %v177_v1 }
  0xb1   :  { %191 = vst [vmem:[#allocation2 + $0x28] sm:$0xff] %v159_v48  ;;  %449 = vxpose.xlu1.b32.cont [6/16] (narrow) %v417_v49, 8  ;;  %207 = vxpose.xlu0.b32.cont [6/16] (narrow) %v159_v48, 8 }
  0xb5   :  { %v178_v3 = vpop.f32.mrf.mxu2  ;;  %v436_v16 = vpop.f32.mrf.mxu3 }
  0xb6   :  { %v161_v53 = vpop.f32.mrf.mxu0  ;;  %v419_v54 = vpop.f32.mrf.mxu1  ;;  %v179_v4 = vadd.f32 %v975_v20, %v178_v3  ;;  %v437_v17 = vadd.f32 %v980_v21, %v436_v16 }
  0xb7   :  { %v162_v55 = vadd.f32 %v975_v20, %v161_v53  ;;  %v420_v56 = vadd.f32 %v980_v21, %v419_v54 }
  0xb8   :  { %199 = vst [vmem:[#allocation2 + $0x68] sm:$0xff] %v179_v4 }
  0xb9   :  { %192 = vst [vmem:[#allocation2 + $0x30] sm:$0xff] %v162_v55  ;;  %450 = vxpose.xlu1.b32.cont [7/16] (narrow) %v420_v56, 8  ;;  %208 = vxpose.xlu0.b32.cont [7/16] (narrow) %v162_v55, 8 }
  0xbd   :  { %v181_v7 = vpop.f32.mrf.mxu2  ;;  %v439_v18 = vpop.f32.mrf.mxu3 }
  0xbe   :  { %v163_v59 = vpop.f32.mrf.mxu0  ;;  %v421_v60 = vpop.f32.mrf.mxu1  ;;  %v182_v8 = vadd.f32 %v975_v20, %v181_v7  ;;  %v440_v19 = vadd.f32 %v980_v21, %v439_v18 }
  0xbf   :  { %v164_v61 = vadd.f32 %v975_v20, %v163_v59  ;;  %v422_v62 = vadd.f32 %v980_v21, %v421_v60 }
  0xc0   :  { %200 = vst [vmem:[#allocation2 + $0x70] sm:$0xff] %v182_v8 }
  0xc1   :  { %193 = vst [vmem:[#allocation2 + $0x38] sm:$0xff] %v164_v61  ;;  %451 = vxpose.xlu1.b32.cont [8/16] (narrow) %v422_v62, 8  ;;  %209 = vxpose.xlu0.b32.cont [8/16] (narrow) %v164_v61, 8 }
  0xc5   :  { %v183_v11 = vpop.f32.mrf.mxu2 }
  0xc6   :  { %v184_v12 = vadd.f32 %v975_v20, %v183_v11  ;;  %v441_v20 = vpop.f32.mrf.mxu3 }
  0xc7   :  { %v442_v22 = vadd.f32 %v980_v21, %v441_v20  ;;  %v35_v21 = vsel %vm31_vm3, %v33_v30, 0.0 }
  0xc8   :  { %201 = vst [vmem:[#allocation2 + $0x78] sm:$0xff] %v184_v12 }
  0xc9   :  { %452 = vxpose.xlu1.b32.cont [9/16] (narrow) %v425_v2, 8  ;;  %210 = vxpose.xlu0.b32.cont [9/16] (narrow) %v167_v39, 8  ;;  %612 = dma.vmem_to_hbm [thread:$0]  %s605_s10, 2048, %s607_s13, [#allocation3], %s863_s14, %s863_s14, %s864_s15  }
  0xd1   :  { %453 = vxpose.xlu1.b32.cont [10/16] (narrow) %v427_v6, 8  ;;  %211 = vxpose.xlu0.b32.cont [10/16] (narrow) %v169_v45, 8 }
  0xd9   :  { %454 = vxpose.xlu1.b32.cont [11/16] (narrow) %v430_v10, 8  ;;  %212 = vxpose.xlu0.b32.cont [11/16] (narrow) %v172_v51, 8 }
  0xe1   :  { %455 = vxpose.xlu1.b32.cont [12/16] (narrow) %v432_v14, 8  ;;  %213 = vxpose.xlu0.b32.cont [12/16] (narrow) %v174_v58, 8 }
  0xe9   :  { %456 = vxpose.xlu1.b32.cont [13/16] (narrow) %v435_v15, 8  ;;  %214 = vxpose.xlu0.b32.cont [13/16] (narrow) %v177_v1, 8 }
  0xf1   :  { %457 = vxpose.xlu1.b32.cont [14/16] (narrow) %v437_v17, 8  ;;  %215 = vxpose.xlu0.b32.cont [14/16] (narrow) %v179_v4, 8 }
  0xf9   :  { %458 = vxpose.xlu1.b32.cont [15/16] (narrow) %v440_v19, 8  ;;  %216 = vxpose.xlu0.b32.cont [15/16] (narrow) %v182_v8, 8 }
 0x101   :  { %459 = vxpose.xlu1.b32.end [16/16] (narrow) %v442_v22, 8  ;;  %217 = vxpose.xlu0.b32.end [16/16] (narrow) %v184_v12, 8 }
 0x12d   :  { %v1024_v31 = vpop.trf.xlu1  ;;  %v1026_v32 = vpop.trf.xlu0 }
 0x12e   :  { %v476_v33 = vrot.slane %v1024_v31, 4  ;;  %v234_v34 = vrot.slane %v1026_v32, 4  ;;  %v265_v35 = vmul.f32 %v1026_v32, %v35_v21  ;;  %v506_v44 = vmul.f32 %v1024_v31, %v35_v21 }
 0x130   :  { %v477_v36 = vmax.f32 %v1024_v31, %v476_v33  ;;  %v235_v37 = vmax.f32 %v1026_v32, %v234_v34  ;;  %266 = vadd.xlane.f32.xlu2 %v265_v35 }
 0x132   :  { %v478_v38 = vrot.slane %v477_v36, 2  ;;  %v236_v39 = vrot.slane %v235_v37, 2 }
 0x134   :  { %v479_v40 = vmax.f32 %v477_v36, %v478_v38  ;;  %v237_v41 = vmax.f32 %v235_v37, %v236_v39 }
 0x136   :  { %v480_v42 = vrot.slane %v479_v40, 1  ;;  %v238_v43 = vrot.slane %v237_v41, 1 }
 0x138   :  { %v481_v45 = vmax.f32 %v479_v40, %v480_v42  ;;  %v239_v46 = vmax.f32 %v237_v41, %v238_v43  ;;  %507 = vadd.xlane.f32.xlu2 %v506_v44 }
 0x13a   :  { %v482_v47 = vsub.f32 %v1024_v31, %v481_v45  ;;  %v240_v48 = vsub.f32 %v1026_v32, %v239_v46 }
 0x13c   :  { %v483_v49 = vmul.f32 1.442695, %v482_v47  ;;  %v241_v50 = vmul.f32 1.442695, %v240_v48 }
 0x13e   :  { %795 = vpow2.f32 %v483_v49 }
 0x13f   :  { %797 = vpow2.f32 %v241_v50 }
 0x144   :  { %v796_v51 = vpop.eup %795 }
 0x145   :  { %v798_v52 = vpop.eup %797  ;;  %v485_v53 = vrot.slane %v796_v51, 4 }
 0x146   :  { %v243_v54 = vrot.slane %v798_v52, 4 }
 0x147   :  { %v486_v55 = vadd.f32 %v796_v51, %v485_v53 }
 0x148   :  { %v244_v56 = vadd.f32 %v798_v52, %v243_v54 }
 0x149   :  { %v487_v57 = vrot.slane %v486_v55, 2 }
 0x14a   :  { %v245_v58 = vrot.slane %v244_v56, 2 }
 0x14b   :  { %v488_v59 = vadd.f32 %v487_v57, %v486_v55 }
 0x14c   :  { %v246_v60 = vadd.f32 %v245_v58, %v244_v56 }
 0x14d   :  { %v489_v61 = vrot.slane %v488_v59, 1 }
 0x14e   :  { %v247_v62 = vrot.slane %v246_v60, 1 }
 0x14f   :  { %v490_v63 = vadd.f32 %v489_v61, %v488_v59 }
 0x150   :  { %v248_v0 = vadd.f32 %v247_v62, %v246_v60 }
 0x151   :  { %799 = vrcp.f32 %v490_v63  ;;  %v528_v10 = vand.u32 2147483648, %v490_v63  ;;  %v526_v14 = vand.u32 2147483647, %v490_v63  ;;  %vm522_vm6 = vweird.f32 %v490_v63 }
 0x152   :  { %801 = vlog2.f32 %v248_v0  ;;  %v287_v16 = vand.u32 2147483648, %v248_v0  ;;  %v285_v18 = vand.u32 2147483647, %v248_v0  ;;  %vm281_vm9 = vweird.f32 %v248_v0 }
 0x153   :  { %803 = vrcp.f32 %v248_v0  ;;  %v529_v22 = vor.u32 1.1754944e-38, %v528_v10  ;;  %vm527_vm10 = vcmp.eq.f32.partialorder %v526_v14, 8.507059e+37 }
 0x154   :  { %805 = vlog2.f32 %v490_v63  ;;  %v288_v29 = vor.u32 1.1754944e-38, %v287_v16  ;;  %vm286_vm12 = vcmp.eq.f32.partialorder %v285_v18, 8.507059e+37 }
 0x157   :  { %v800_v1 = vpop.eup %799 }
 0x158   :  { %v802_v2 = vpop.eup %801  ;;  %v518_v3 = vmul.f32 %v800_v1, %v490_v63  ;;  %vm523_vm5 = vweird.f32 %v800_v1 }
 0x159   :  { %v804_v4 = vpop.eup %803  ;;  %v250_v5 = vmul.f32 0.6931472, %v802_v2  ;;  %vm524_vm8 = vmor %vm522_vm6, %vm523_vm5 }
 0x15a   :  { %v806_v6 = vpop.eup %805  ;;  %v277_v7 = vmul.f32 %v804_v4, %v248_v0  ;;  %v519_v8 = vsub.f32 1.0, %v518_v3  ;;  %vm282_vm7 = vweird.f32 %v804_v4 }
 0x15b   :  { %v251_v9 = vadd.f32 %v250_v5, %v239_v46  ;;  %v492_v11 = vmul.f32 0.6931472, %v806_v6  ;;  %vm283_vm11 = vmor %vm281_vm9, %vm282_vm7  ;;  %v574_v5 = vsel %vm253_vm4, %v1017_v27, 0.0 }
 0x15c   :  { %v278_v12 = vsub.f32 1.0, %v277_v7  ;;  %v520_v13 = vmul.f32 %v800_v1, %v519_v8 }
 0x15d   :  { %v252_v15 = vmul.f32 %v1017_v27, %v251_v9  ;;  %v493_v23 = vadd.f32 %v492_v11, %v481_v45  ;;  %v291_v39 = vsub.f32 %v1026_v32, %v251_v9 }
 0x15e   :  { %v279_v17 = vmul.f32 %v804_v4, %v278_v12  ;;  %v521_v19 = vadd.f32 %v800_v1, %v520_v13 }
 0x15f   :  { %v254_v20 = vsel %vm253_vm4, %v252_v15, 0.0  ;;  %v494_v35 = vmul.f32 %v1017_v27, %v493_v23  ;;  %v532_v41 = vsub.f32 %v1024_v31, %v493_v23 }
 0x160   :  { %v280_v25 = vadd.f32 %v804_v4, %v279_v17  ;;  %v525_v26 = vsel %vm524_vm8, %v800_v1, %v521_v19  ;;  %255 = vadd.xlane.f32.xlu2 %v254_v20 }
 0x161   :  { %v530_v30 = vsel %vm527_vm10, %v529_v22, %v525_v26  ;;  %v495_v38 = vsel %vm253_vm4, %v494_v35, 0.0 }
 0x162   :  { %v284_v21 = vsel %vm283_vm11, %v804_v4, %v280_v25  ;;  %v531_v33 = vmul.f32 %v796_v51, %v530_v30 }
 0x163   :  { %v289_v34 = vsel %vm286_vm12, %v288_v29, %v284_v21 }
 0x164   :  { %v290_v36 = vmul.f32 %v798_v52, %v289_v34 }
 0x166   :  { %v533_v37 = vadd.f32 %v531_v33, %v290_v36 }
 0x168   :  { %v534_v40 = vmul.f32 0.5, %v533_v37  ;;  %496 = vadd.xlane.f32.xlu2 %v495_v38  ;;  %v585_v38 = vand.u32 127, %v28_v24 }
 0x16a   :  { %v545_v42 = vmul.f32 %v534_v40, %v291_v39  ;;  %v553_v43 = vmul.f32 %v534_v40, %v532_v41  ;;  %v535_v44 = vadd.f32 1e-05, %v534_v40  ;;  %v586_v39 = vmul.u32 128, %v1020_v28 }
 0x16c   :  { %v546_v45 = vrot.slane %v545_v42, 4  ;;  %v554_v46 = vrot.slane %v553_v43, 4  ;;  %807 = vlog2.f32 %v535_v44 }
 0x16e   :  { %v547_v47 = vadd.f32 %v546_v45, %v545_v42  ;;  %v555_v48 = vadd.f32 %v554_v46, %v553_v43 }
 0x170   :  { %v548_v49 = vrot.slane %v547_v47, 2  ;;  %v556_v50 = vrot.slane %v555_v48, 2 }
 0x172   :  { %v808_v51 = vpop.eup %807  ;;  %v549_v52 = vadd.f32 %v548_v49, %v547_v47  ;;  %v557_v53 = vadd.f32 %v556_v50, %v555_v48 }
 0x173   :  { %v537_v54 = vmul.f32 0.6931472, %v808_v51 }
 0x174   :  { %v550_v55 = vrot.slane %v549_v52, 1  ;;  %v558_v32 = vrot.slane %v557_v53, 1 }
 0x175   :  { %v538_v56 = vmul.f32 %v537_v54, %v534_v40  ;;  %v587_v40 = vadd.s32 %v586_v39, %v585_v38 }
 0x176   :  { %v551_v57 = vadd.f32 %v550_v55, %v549_v52  ;;  %v559_v31 = vadd.f32 %v558_v32, %v557_v53 }
 0x177   :  { %v539_v58 = vrot.slane %v538_v56, 4  ;;  %vm591_vm13 = vcmp.eq.s32.totalorder %v587_v40, 1  ;;  %vm588_vm14 = vcmp.eq.s32.totalorder %v587_v40, 0  ;;  %vm595_vm15 = vcmp.eq.s32.totalorder %v587_v40, 2 }
 0x178   :  { %v560_v59 = vadd.f32 %v559_v31, %v551_v57 }
 0x179   :  { %v540_v60 = vadd.f32 %v539_v58, %v538_v56 }
 0x17b   :  { %v541_v61 = vrot.slane %v540_v60, 2 }
 0x17d   :  { %v542_v62 = vadd.f32 %v541_v61, %v540_v60 }
 0x17f   :  { %v543_v63 = vrot.slane %v542_v62, 1 }
 0x181   :  { %v544_v0 = vadd.f32 %v543_v63, %v542_v62 }
 0x183   :  { %v561_v1 = vmul.f32 2.0, %v544_v0 }
 0x185   :  { %v562_v2 = vsub.f32 %v561_v1, %v560_v59 }
 0x187   :  { %v563_v3 = vmul.f32 %v1017_v27, %v562_v2 }
 0x189   :  { %v564_v4 = vsel %vm253_vm4, %v563_v3, 0.0 }
 0x18a   :  { %565 = vadd.xlane.f32.xlu2 %v564_v4 }
 0x192   :  { %575 = vadd.xlane.f32.xlu2 %v574_v5 }
 0x1a3   :  { %v267_v6 = vpop.xlane.xlu2 %266 }
 0x1a4   :  { %v268_v7 = vrot.slane %v267_v6, 4 }
 0x1a6   :  { %v269_v9 = vadd.f32 %v268_v7, %v267_v6 }
 0x1a8   :  { %v270_v10 = vrot.slane %v269_v9, 2 }
 0x1aa   :  { %v271_v15 = vadd.f32 %v270_v10, %v269_v9 }
 0x1ab   :  { %v508_v8 = vpop.xlane.xlu2 %507 }
 0x1ac   :  { %v509_v11 = vrot.slane %v508_v8, 4  ;;  %v272_v20 = vrot.slane %v271_v15, 1 }
 0x1ae   :  { %v510_v14 = vadd.f32 %v509_v11, %v508_v8  ;;  %v273_v29 = vadd.f32 %v272_v20, %v271_v15 }
 0x1b0   :  { %v511_v18 = vrot.slane %v510_v14, 2 }
 0x1b2   :  { %v512_v30 = vadd.f32 %v511_v18, %v510_v14 }
 0x1b4   :  { %v513_v34 = vrot.slane %v512_v30, 1 }
 0x1b6   :  { %v514_v37 = vadd.f32 %v513_v34, %v512_v30 }
 0x1d3   :  { %v256_v12 = vpop.xlane.xlu2 %255 }
 0x1d4   :  { %v257_v27 = vrot.slane %v256_v12, 4 }
 0x1d6   :  { %v258_v13 = vadd.f32 %v257_v27, %v256_v12 }
 0x1d8   :  { %v259_v16 = vrot.slane %v258_v13, 2 }
 0x1da   :  { %v260_v17 = vadd.f32 %v259_v16, %v258_v13 }
 0x1db   :  { %v497_v19 = vpop.xlane.xlu2 %496 }
 0x1dc   :  { %v498_v22 = vrot.slane %v497_v19, 4  ;;  %v261_v23 = vrot.slane %v260_v17, 1 }
 0x1de   :  { %v499_v25 = vadd.f32 %v498_v22, %v497_v19  ;;  %v262_v26 = vadd.f32 %v261_v23, %v260_v17 }
 0x1e0   :  { %v500_v21 = vrot.slane %v499_v25, 2  ;;  %776 = vpush %v262_v26 }
 0x1e1   :  { %778 = vpush %v273_v29 }
 0x1e2   :  { %v501_v33 = vadd.f32 %v500_v21, %v499_v25 }
 0x1e4   :  { %v502_v35 = vrot.slane %v501_v33, 1 }
 0x1e6   :  { %v503_v36 = vadd.f32 %v502_v35, %v501_v33 }
 0x1e8   :  { %780 = vpush %v503_v36 }
 0x1e9   :  { %782 = vpush %v514_v37 }
 0x1fd   :  { %v566_v41 = vpop.xlane.xlu2 %565 }
 0x1fe   :  { %v567_v42 = vrot.slane %v566_v41, 4 }
 0x200   :  { %v568_v43 = vadd.f32 %v567_v42, %v566_v41 }
 0x202   :  { %v569_v44 = vrot.slane %v568_v43, 2 }
 0x204   :  { %v570_v45 = vadd.f32 %v569_v44, %v568_v43 }
 0x205   :  { %v576_v46 = vpop.xlane.xlu2 %575 }
 0x206   :  { %v577_v47 = vrot.slane %v576_v46, 4  ;;  %v571_v48 = vrot.slane %v570_v45, 1 }
 0x208   :  { %v578_v49 = vadd.f32 %v577_v47, %v576_v46  ;;  %v572_v50 = vadd.f32 %v571_v48, %v570_v45 }
 0x20a   :  { %v579_v51 = vrot.slane %v578_v49, 2  ;;  %784 = vpush %v572_v50 }
 0x20c   :  { %v580_v52 = vadd.f32 %v579_v51, %v578_v49 }
 0x20e   :  { %v581_v53 = vrot.slane %v580_v52, 1 }
 0x210   :  { %v582_v54 = vadd.f32 %v581_v53, %v580_v52 }
 0x211   :  { %s777_s4 = spop %776 }
 0x212   :  { %786 = vpush %v582_v54  ;;  %s779_s16 = spop %778 }
 0x213   :  { %s275_s18 = ssub.f32 %s777_s4, %s779_s16 }
 0x219   :  { %s781_s17 = spop %780 }
 0x21a   :  { %s505_s19 = sadd.f32 %s781_s17, %s275_s18  ;;  %s783_s20 = spop %782 }
 0x21c   :  { %s516_s22 = ssub.f32 %s505_s19, %s783_s20 }
 0x21e   :  { %v589_v28 = vstv %s516_s22 }
 0x21f   :  { %v590_v32 = vsel %vm588_vm14, %v589_v28, 0.0 }
 0x23b   :  { %s785_s21 = spop %784 }
 0x23c   :  { %v592_v24 = vstv %s785_s21 }
 0x23d   :  { %v593_v55 = vsel %vm591_vm13, %v592_v24, 0.0 }
 0x23e   :  { %v594_v56 = vadd.f32 %v593_v55, %v590_v32 }
 0x243   :  { %s787_s25 = spop %786 }
 0x244   :  { %v596_v57 = vstv %s787_s25 }
 0x245   :  { %v597_v31 = vsel %vm595_vm15, %v596_v57, 0.0 }
 0x246   :  { %v598_v58 = vadd.f32 %v597_v31, %v594_v56 }
 0x248   :  { %599 = vst [vmem:[#allocation4] sm:$0xff] %v598_v58 }
 0x249   :  { %623 = dma.vmem_to_hbm [thread:$0]  %s619_s24, 128, %s621_s28, [#allocation5]  }
 0x24a   :  { %857 = dma.done.wait [#allocation3], 2048  }
 0x24b   :  { %858 = vsyncadd [#allocation3], 4294965248 }
 0x24c   :  { %859 = dma.done.wait [#allocation5], 128  }
 0x24d   :  { %860 = vsyncadd [#allocation5], 4294967168 }
 0x24e   :  { %632 = vsyncpa [#allocation3], 1 }
 0x24f   :  { %633 = vsyncpa [#allocation5], 1 }

</bundles_post_ra>
